<compile_context>
chip_gen: v7x
topology: tpu7x:2x2x1
jax: 0.10.0
libtpu: 0.0.40
codegen_flags: <defaults>
</compile_context>

<pallas_src>
import functools

import jax
import jax.numpy as jnp
import numpy as np
from jax import lax
from jax.experimental import pallas as pl
from jax.experimental.pallas import tpu as pltpu

_EPS = 1e-12          # F.normalize default eps
_EPS2 = _EPS * _EPS   # clamp on the *squared* norm == max(||x||, eps) semantics


# ---------------------------------------------------------------------------
# Helpers
# ---------------------------------------------------------------------------
def _round_up(x, m):
    return ((x + m - 1) // m) * m


def _sublane_multiple(dtype):
    # rows per packed sublane tile: f32 -> 8, bf16 -> 16, int8/fp8 -> 32
    return max(8, 32 // jnp.dtype(dtype).itemsize)


def _vmem_limit_bytes():
    """Generation-aware scoped-VMEM limit (leave headroom for compiler scratch)."""
    try:
        cap = int(pltpu.get_tpu_info().vmem_capacity_bytes)
    except Exception:
        cap = 128 * 1024 * 1024
    # ~102 MiB on v5e/v6e (128 MiB physical), ~51 MiB on v7x (64 MiB physical)
    return max(32 * 1024 * 1024, int(cap * 0.8))


def _single_buffered_spec(shape, index_map):
    """Weights only change along the outer layer axis -> double-buffering them is
    pure VMEM waste.  Fall back to a plain spec if pipeline_mode is unavailable."""
    try:
        return pl.BlockSpec(shape, index_map, pipeline_mode=pl.Buffered(1))
    except (AttributeError, TypeError):
        return pl.BlockSpec(shape, index_map)


# ---------------------------------------------------------------------------
# Kernels (grid = (L, num_row_tiles); per-block partial sums, no accumulator)
# ---------------------------------------------------------------------------
def _masked_neg_cos_sum(h, ht32, row_base, num_rows, tile_m):
    """Fused cosine similarity (no full-width divides) + ragged-row mask."""
    dots = jnp.sum(h * ht32, axis=-1, keepdims=True)
    ss_s = jnp.sum(h * h, axis=-1, keepdims=True)
    ss_t = jnp.sum(ht32 * ht32, axis=-1, keepdims=True)
    cos = dots * lax.rsqrt(jnp.maximum(ss_s, _EPS2)) \
               * lax.rsqrt(jnp.maximum(ss_t, _EPS2))
    rows = lax.broadcasted_iota(jnp.int32, (tile_m, 1), 0) + row_base
    neg = jnp.where(rows < num_rows, -cos, jnp.float32(0.0))
    return jnp.sum(neg)


def _kd_ident_kernel(hs_ref, ht_ref, out_ref, *, num_rows, tile_m):
    """Identity projection (dim_student == dim_teacher)."""
    i = pl.program_id(1)
    hs = hs_ref[0].astype(jnp.float32)          # [tile_m, D]
    ht = ht_ref[0].astype(jnp.float32)          # [tile_m, D]
    total = _masked_neg_cos_sum(hs, ht, i * tile_m, num_rows, tile_m)
    out_ref[...] = jnp.full(out_ref.shape, total, jnp.float32)


def _kd_proj_kernel(hs_ref, ht_ref, w1_ref, b1_ref, w2_ref, b2_ref, out_ref,
                    *, num_rows, tile_m):
    """MLP projection (Linear -> GELU(tanh) -> Linear) + cosine loss."""
    i = pl.program_id(1)

    hs = hs_ref[0]                              # [tile_m, Ds], native dtype
    w1 = w1_ref[0]                              # [Ds, Dh]  bf16
    w2 = w2_ref[0]                              # [Dh, Dt]  bf16
    b1 = b1_ref[0].astype(jnp.float32)          # [1, Dh]
    b2 = b2_ref[0].astype(jnp.float32)          # [1, Dt]

    # bf16 MXU operands, f32 accumulation.
    h = jnp.dot(hs.astype(w1.dtype), w1, preferred_element_type=jnp.float32) + b1
    # TODO(synk): assumed tanh GELU; PyTorch nn.GELU default is exact erf.
    h = jax.nn.gelu(h, approximate=True)
    h = jnp.dot(h.astype(w2.dtype), w2, preferred_element_type=jnp.float32) + b2

    # Teacher tile kept native in HBM/VMEM; cast fused into the consumers.
    ht32 = ht_ref[0].astype(jnp.float32)        # [tile_m, Dt]
    total = _masked_neg_cos_sum(h, ht32, i * tile_m, num_rows, tile_m)
    out_ref[...] = jnp.full(out_ref.shape, total, jnp.float32)


# ---------------------------------------------------------------------------
# Wrapper: one pallas_call over all (layer, row-tile) pairs
# ---------------------------------------------------------------------------
def knowledge_distillation_loss(hs_stack, ht_stack, proj_params=None,
                                tile_m=None):
    """hs_stack: [L, M, Ds], ht_stack: [L, M, Dt] -> scalar loss."""
    L, M, Ds = hs_stack.shape
    Lt, Mt, Dt = ht_stack.shape
    assert (L, M) == (Lt, Mt)

    align = max(_sublane_multiple(hs_stack.dtype),
                _sublane_multiple(ht_stack.dtype))
    if tile_m is None:
        # Identity path is pure HBM streaming -> bigger tiles approach roofline;
        # projection path: 512 amortizes grid overhead / MXU drain.
        tile_m = 512 if proj_params is not None else 1024

    # Row tile: sublane-aligned, never larger than the row count (ragged last
    # tile handled by in-kernel masking, no jnp.pad HBM copy).
    if M >= align:
        tm = min(_round_up(tile_m, align), (M // align) * align)
    else:
        tm = M                                   # block dim == full array dim

    # VMEM budget clamp: double-buffered activations + f32 intermediates
    # + (single-buffered) weights must fit under the scoped limit.
    vmem_limit = _vmem_limit_bytes()
    isz_s = jnp.dtype(hs_stack.dtype).itemsize
    isz_t = jnp.dtype(ht_stack.dtype).itemsize
    if proj_params is not None:
        w1, b1, w2, b2 = proj_params            # stacked: [L,Ds,Dh],[L,1,Dh],...
        Dh = w1.shape[-1]
        w_isz = jnp.dtype(w1.dtype).itemsize
        weight_bytes = (Ds * Dh + Dh * Dt) * w_isz + (Dh + Dt) * 4
        per_row = 2 * (Ds * isz_s + Dt * isz_t) + (Dh + 2 * Dt) * 4
    else:
        weight_bytes = 0
        per_row = 2 * (Ds * isz_s + Dt * isz_t) + (Ds + Dt) * 4
    budget = vmem_limit - weight_bytes - (8 << 20)
    if budget > 0 and tm >= align:
        tm_cap = max(align, (budget // per_row) // align * align)
        tm = min(tm, tm_cap)

    n_tiles = -(-M // tm)
    grid = (L, n_tiles)

    # Per-block partial sums in lane-aligned (8,128) tiles (valid layout, and
    # unique block per grid point -> both axes parallelizable on v7x megacore).
    out_shape = jax.ShapeDtypeStruct((L, n_tiles, 8, 128), jnp.float32)
    out_spec = pl.BlockSpec((1, 1, 8, 128), lambda l, i: (l, i, 0, 0))

    if proj_params is None:
        kernel = functools.partial(_kd_ident_kernel, num_rows=M, tile_m=tm)
        in_specs = [
            pl.BlockSpec((1, tm, Ds), lambda l, i: (l, i, 0)),
            pl.BlockSpec((1, tm, Dt), lambda l, i: (l, i, 0)),
        ]
        args = (hs_stack, ht_stack)
    else:
        kernel = functools.partial(_kd_proj_kernel, num_rows=M, tile_m=tm)
        in_specs = [
            pl.BlockSpec((1, tm, Ds), lambda l, i: (l, i, 0)),
            pl.BlockSpec((1, tm, Dt), lambda l, i: (l, i, 0)),
            # Weights/biases: constant block per layer, single-buffered.
            _single_buffered_spec((1, Ds, Dh), lambda l, i: (l, 0, 0)),
            _single_buffered_spec((1, 1, Dh), lambda l, i: (l, 0, 0)),
            _single_buffered_spec((1, Dh, Dt), lambda l, i: (l, 0, 0)),
            _single_buffered_spec((1, 1, Dt), lambda l, i: (l, 0, 0)),
        ]
        args = (hs_stack, ht_stack, w1, b1, w2, b2)

    partials = pl.pallas_call(
        kernel,
        out_shape=out_shape,
        grid=grid,
        in_specs=in_specs,
        out_specs=out_spec,
        compiler_params=pltpu.CompilerParams(
            dimension_semantics=("parallel", "parallel"),
            vmem_limit_bytes=vmem_limit,
        ),
    )(*args)

    # mean over layers of mean over rows (equal M per layer).
    total = jnp.sum(partials[:, :, 0, 0])
    return total / (L * M)


# ---------------------------------------------------------------------------
# KnowledgeDistillationLoss (parameter setup is plain JAX glue)
# ---------------------------------------------------------------------------
def _init_linear(key, fan_in, fan_out):
    kw, kb = jax.random.split(key)
    bound = 1.0 / np.sqrt(fan_in)
    w = jax.random.uniform(kw, (fan_in, fan_out), jnp.float32, -bound, bound)
    b = jax.random.uniform(kb, (fan_out,), jnp.float32, -bound, bound)
    return w, b


class KnowledgeDistillationLossPallas:
    def __init__(self, dim_student, dim_teacher, layer_inds_student,
                 layer_inds_teacher, key, tile_m=None):
        assert len(layer_inds_student) == len(layer_inds_teacher)
        self.layer_inds_student = list(layer_inds_student)
        self.layer_inds_teacher = list(layer_inds_teacher)
        self.tile_m = tile_m
        if dim_student != dim_teacher:
            w1s, b1s, w2s, b2s = [], [], [], []
            for _ in range(len(self.layer_inds_student)):
                key, k1, k2 = jax.random.split(key, 3)
                w1, b1 = _init_linear(k1, dim_student, dim_student)
                w2, b2 = _init_linear(k2, dim_student, dim_teacher)
                # bf16 weights (MXU operands / half the resident VMEM);
                # biases stay f32.
                w1s.append(w1.astype(jnp.bfloat16))
                b1s.append(b1)
                w2s.append(w2.astype(jnp.bfloat16))
                b2s.append(b2)
            self.params = (
                jnp.stack(w1s),                 # [L, Ds, Dh] bf16
                jnp.stack(b1s)[:, None, :],     # [L, 1, Dh]  f32
                jnp.stack(w2s),                 # [L, Dh, Dt] bf16
                jnp.stack(b2s)[:, None, :],     # [L, 1, Dt]  f32
            )
        else:
            self.params = None

    def __call__(self, h_student_list, h_teacher_list):
        # Stack the selected layer pairs; keep native dtype (no f32 upcast).
        hs = jnp.stack([
            h_student_list[si].reshape(-1, h_student_list[si].shape[-1])
            for si in self.layer_inds_student])               # [L, M, Ds]
        ht = jnp.stack([
            h_teacher_list[ti].reshape(-1, h_teacher_list[ti].shape[-1])
            for ti in self.layer_inds_teacher])                # [L, M, Dt]
        return knowledge_distillation_loss(hs, ht, self.params,
                                           tile_m=self.tile_m)


# ---------------------------------------------------------------------------
# Pure-JAX reference (same math, no Pallas) for a sanity check
# ---------------------------------------------------------------------------
def _ref_loss(h_student_list, h_teacher_list, kd):
    total = jnp.float32(0.0)
    L = len(kd.layer_inds_student)
    for idx, (si, ti) in enumerate(zip(kd.layer_inds_student,
                                       kd.layer_inds_teacher)):
        hs = h_student_list[si].reshape(-1, h_student_list[si].shape[-1])
        ht = h_teacher_list[ti].reshape(
            -1, h_teacher_list[ti].shape[-1]).astype(jnp.float32)
        if kd.params is not None:
            w1, b1, w2, b2 = (p[idx] for p in kd.params)
            h = jnp.dot(hs.astype(w1.dtype), w1,
                        preferred_element_type=jnp.float32) + b1.astype(jnp.float32)
            h = jax.nn.gelu(h, approximate=True)
            h = jnp.dot(h.astype(w2.dtype), w2,
                        preferred_element_type=jnp.float32) + b2.astype(jnp.float32)
        else:
            h = hs.astype(jnp.float32)
        hn = h / jnp.maximum(jnp.linalg.norm(h, axis=-1, keepdims=True), _EPS)
        tn = ht / jnp.maximum(jnp.linalg.norm(ht, axis=-1, keepdims=True), _EPS)
        total = total + jnp.mean(-jnp.sum(hn * tn, axis=-1))
    return total / L


if __name__ == "__main__":
    key = jax.random.PRNGKey(0)
    B, N = 2, 9                       # M = 18 -> exercises the ragged-tile mask
    dim_student, dim_teacher = 32, 64
    n_student_layers, n_teacher_layers = 3, 3
    layer_inds_student = [0, 2]
    layer_inds_teacher = [1, 2]

    key, kp, ks, kt = jax.random.split(key, 4)
    h_student_list = [
        jax.random.normal(jax.random.fold_in(ks, i), (B, N, dim_student), jnp.float32)
        for i in range(n_student_layers)
    ]
    h_teacher_list = [
        jax.random.normal(jax.random.fold_in(kt, i), (B, N, dim_teacher), jnp.float32)
        for i in range(n_teacher_layers)
    ]

    # --- projection path (dim_student != dim_teacher) -----------------------
    kd = KnowledgeDistillationLossPallas(dim_student, dim_teacher,
                                         layer_inds_student, layer_inds_teacher,
                                         kp)
    loss = jax.block_until_ready(kd(h_student_list, h_teacher_list))
    ref = jax.block_until_ready(_ref_loss(h_student_list, h_teacher_list, kd))
    np.testing.assert_allclose(np.array(loss), np.array(ref),
                               rtol=1e-3, atol=1e-4)

    # --- identity path (dim_student == dim_teacher) --------------------------
    kd_id = KnowledgeDistillationLossPallas(dim_teacher, dim_teacher,
                                            layer_inds_student,
                                            layer_inds_teacher, kp)
    loss_id = jax.block_until_ready(kd_id(h_teacher_list, h_teacher_list))
    ref_id = jax.block_until_ready(_ref_loss(h_teacher_list, h_teacher_list,
                                             kd_id))
    np.testing.assert_allclose(np.array(loss_id), np.array(ref_id),
                               rtol=1e-3, atol=1e-4)

    print("KERNEL_OK")
</pallas_src>

<mosaic_0001>
module attributes {stable_mosaic.version = 11 : i64} {
  func.func @_kd_proj_kernel(%arg0: i32, %arg1: i32, %arg2: memref<1x16x32xf32, #tpu.memory_space<vmem>>, %arg3: memref<1x16x64xf32, #tpu.memory_space<vmem>>, %arg4: memref<1x32x32xbf16, #tpu.memory_space<vmem>>, %arg5: memref<1x1x32xf32, #tpu.memory_space<vmem>>, %arg6: memref<1x32x64xbf16, #tpu.memory_space<vmem>>, %arg7: memref<1x1x64xf32, #tpu.memory_space<vmem>>, %arg8: memref<1x1x8x128xf32, #tpu.memory_space<vmem>>) attributes {dimension_semantics = [#tpu.dimension_semantics<parallel>, #tpu.dimension_semantics<parallel>], iteration_bounds = array<i64: 2, 2>, scalar_prefetch = 0 : i64, scratch_operands = 0 : i64, tpu.core_type = #tpu.core_type<tc>, window_params = [{transform_indices = @transform_0, window_bounds = array<i64: 1, 16, 32>}, {transform_indices = @transform_1, window_bounds = array<i64: 1, 16, 64>}, {pipeline_mode = #tpu.pipeline_mode<synchronous>, transform_indices = @transform_2, window_bounds = array<i64: 1, 32, 32>}, {pipeline_mode = #tpu.pipeline_mode<synchronous>, transform_indices = @transform_3, window_bounds = array<i64: 1, 1, 32>}, {pipeline_mode = #tpu.pipeline_mode<synchronous>, transform_indices = @transform_4, window_bounds = array<i64: 1, 32, 64>}, {pipeline_mode = #tpu.pipeline_mode<synchronous>, transform_indices = @transform_5, window_bounds = array<i64: 1, 1, 64>}, {transform_indices = @transform_6, window_bounds = array<i64: 1, 1, 8, 128>}]} {
    %c0 = arith.constant 0 : index
    %c0_0 = arith.constant 0 : index
    %c0_1 = arith.constant 0 : index
    %0 = vector.load %arg2[%c0, %c0_0, %c0_1] : memref<1x16x32xf32, #tpu.memory_space<vmem>>, vector<1x16x32xf32>
    %1 = vector.shape_cast %0 : vector<1x16x32xf32> to vector<16x32xf32>
    %c0_2 = arith.constant 0 : index
    %c0_3 = arith.constant 0 : index
    %c0_4 = arith.constant 0 : index
    %2 = vector.load %arg4[%c0_2, %c0_3, %c0_4] : memref<1x32x32xbf16, #tpu.memory_space<vmem>>, vector<1x32x32xbf16>
    %3 = vector.shape_cast %2 : vector<1x32x32xbf16> to vector<32x32xbf16>
    %c0_5 = arith.constant 0 : index
    %c0_6 = arith.constant 0 : index
    %c0_7 = arith.constant 0 : index
    %4 = vector.load %arg6[%c0_5, %c0_6, %c0_7] : memref<1x32x64xbf16, #tpu.memory_space<vmem>>, vector<1x32x64xbf16>
    %5 = vector.shape_cast %4 : vector<1x32x64xbf16> to vector<32x64xbf16>
    %c0_8 = arith.constant 0 : index
    %c0_9 = arith.constant 0 : index
    %c0_10 = arith.constant 0 : index
    %6 = vector.load %arg5[%c0_8, %c0_9, %c0_10] : memref<1x1x32xf32, #tpu.memory_space<vmem>>, vector<1x1x32xf32>
    %7 = vector.shape_cast %6 : vector<1x1x32xf32> to vector<1x32xf32>
    %c0_11 = arith.constant 0 : index
    %c0_12 = arith.constant 0 : index
    %c0_13 = arith.constant 0 : index
    %8 = vector.load %arg7[%c0_11, %c0_12, %c0_13] : memref<1x1x64xf32, #tpu.memory_space<vmem>>, vector<1x1x64xf32>
    %9 = vector.shape_cast %8 : vector<1x1x64xf32> to vector<1x64xf32>
    %10 = arith.truncf %1 : vector<16x32xf32> to vector<16x32xbf16>
    %cst = arith.constant dense<0.000000e+00> : vector<16x32xf32>
    %11 = tpu.matmul %10, %3, %cst {dimension_numbers = #tpu.dot_dimension_numbers<[1], [0], [0], [1], [0, 0, 1, 1], [], []>} : vector<16x32xbf16>, vector<32x32xbf16>, vector<16x32xf32> -> vector<16x32xf32>
    %12 = vector.broadcast %7 : vector<1x32xf32> to vector<16x32xf32>
    %13 = arith.addf %11, %12 : vector<16x32xf32>
    %14 = arith.mulf %13, %13 : vector<16x32xf32>
    %15 = arith.mulf %13, %14 : vector<16x32xf32>
    %cst_14 = arith.constant 4.471500e-02 : f32
    %16 = vector.broadcast %cst_14 : f32 to vector<16x32xf32>
    %17 = arith.mulf %16, %15 : vector<16x32xf32>
    %18 = arith.addf %13, %17 : vector<16x32xf32>
    %cst_15 = arith.constant 0.797884583 : f32
    %19 = vector.broadcast %cst_15 : f32 to vector<16x32xf32>
    %20 = arith.mulf %19, %18 : vector<16x32xf32>
    %21 = math.tanh %20 : vector<16x32xf32>
    %cst_16 = arith.constant 1.000000e+00 : f32
    %22 = vector.broadcast %cst_16 : f32 to vector<16x32xf32>
    %23 = arith.addf %22, %21 : vector<16x32xf32>
    %cst_17 = arith.constant 5.000000e-01 : f32
    %24 = vector.broadcast %cst_17 : f32 to vector<16x32xf32>
    %25 = arith.mulf %24, %23 : vector<16x32xf32>
    %26 = arith.mulf %13, %25 : vector<16x32xf32>
    %27 = arith.truncf %26 : vector<16x32xf32> to vector<16x32xbf16>
    %cst_18 = arith.constant dense<0.000000e+00> : vector<16x64xf32>
    %28 = tpu.matmul %27, %5, %cst_18 {dimension_numbers = #tpu.dot_dimension_numbers<[1], [0], [0], [1], [0, 0, 1, 1], [], []>} : vector<16x32xbf16>, vector<32x64xbf16>, vector<16x64xf32> -> vector<16x64xf32>
    %29 = vector.broadcast %9 : vector<1x64xf32> to vector<16x64xf32>
    %30 = arith.addf %28, %29 : vector<16x64xf32>
    %c0_19 = arith.constant 0 : index
    %c0_20 = arith.constant 0 : index
    %c0_21 = arith.constant 0 : index
    %31 = vector.load %arg3[%c0_19, %c0_20, %c0_21] : memref<1x16x64xf32, #tpu.memory_space<vmem>>, vector<1x16x64xf32>
    %32 = vector.shape_cast %31 : vector<1x16x64xf32> to vector<16x64xf32>
    %c16_i32 = arith.constant 16 : i32
    %33 = arith.muli %arg1, %c16_i32 : i32
    %34 = arith.mulf %30, %32 : vector<16x64xf32>
    %cst_22 = arith.constant dense<0.000000e+00> : vector<16xf32>
    %35 = vector.multi_reduction <add>, %34, %cst_22 [1] : vector<16x64xf32> to vector<16xf32>
    %36 = vector.shape_cast %35 : vector<16xf32> to vector<16x1xf32>
    %37 = arith.mulf %30, %30 : vector<16x64xf32>
    %cst_23 = arith.constant dense<0.000000e+00> : vector<16xf32>
    %38 = vector.multi_reduction <add>, %37, %cst_23 [1] : vector<16x64xf32> to vector<16xf32>
    %39 = vector.shape_cast %38 : vector<16xf32> to vector<16x1xf32>
    %40 = arith.mulf %32, %32 : vector<16x64xf32>
    %cst_24 = arith.constant dense<0.000000e+00> : vector<16xf32>
    %41 = vector.multi_reduction <add>, %40, %cst_24 [1] : vector<16x64xf32> to vector<16xf32>
    %42 = vector.shape_cast %41 : vector<16xf32> to vector<16x1xf32>
    %cst_25 = arith.constant 1.000000e-24 : f32
    %43 = vector.broadcast %cst_25 : f32 to vector<16x1xf32>
    %44 = arith.maximumf %39, %43 : vector<16x1xf32>
    %45 = math.rsqrt %44 : vector<16x1xf32>
    %46 = arith.mulf %36, %45 : vector<16x1xf32>
    %cst_26 = arith.constant 1.000000e-24 : f32
    %47 = vector.broadcast %cst_26 : f32 to vector<16x1xf32>
    %48 = arith.maximumf %42, %47 : vector<16x1xf32>
    %49 = math.rsqrt %48 : vector<16x1xf32>
    %50 = arith.mulf %46, %49 : vector<16x1xf32>
    %51 = tpu.iota {dimensions = array<i32: 0>} : vector<16x1xi32>
    %52 = vector.broadcast %33 : i32 to vector<16x1xi32>
    %53 = arith.addi %51, %52 : vector<16x1xi32>
    %c18_i32 = arith.constant 18 : i32
    %54 = vector.broadcast %c18_i32 : i32 to vector<16x1xi32>
    %55 = arith.cmpi slt, %53, %54 : vector<16x1xi32>
    %cst_27 = arith.constant 0.000000e+00 : f32
    %56 = vector.broadcast %cst_27 : f32 to vector<16x1xf32>
    %57 = arith.subf %56, %50 : vector<16x1xf32>
    %cst_28 = arith.constant 0.000000e+00 : f32
    %58 = vector.broadcast %cst_28 : f32 to vector<16x1xf32>
    %59 = arith.select %55, %57, %58 : vector<16x1xi1>, vector<16x1xf32>
    %60 = vector.shape_cast %59 : vector<16x1xf32> to vector<1x16x1xf32>
    %cst_29 = arith.constant dense<0.000000e+00> : vector<1xf32>
    %61 = vector.multi_reduction <add>, %60, %cst_29 [1, 2] : vector<1x16x1xf32> to vector<1xf32>
    %62 = vector.shape_cast %61 : vector<1xf32> to vector<1x1x1xf32>
    %63 = vector.extract %62[0, 0, 0] : f32 from vector<1x1x1xf32>
    %64 = vector.broadcast %63 : f32 to vector<1x1x8x128xf32>
    %c0_30 = arith.constant 0 : index
    %c0_31 = arith.constant 0 : index
    %c0_32 = arith.constant 0 : index
    %c0_33 = arith.constant 0 : index
    %65 = vector.load %arg8[%c0_30, %c0_31, %c0_32, %c0_33] : memref<1x1x8x128xf32, #tpu.memory_space<vmem>>, vector<1x1x8x128xf32>
    tpu.vector_store %arg8[%c0_30, %c0_31, %c0_32, %c0_33], %64 {strides = array<i32>} : memref<1x1x8x128xf32, #tpu.memory_space<vmem>>, vector<1x1x8x128xf32>,
    return
  }
  func.func @transform_0(%arg0: i32, %arg1: i32) -> (i32, i32, i32) {
    %c0_i32 = arith.constant 0 : i32
    %c0_i32_0 = arith.constant 0 : i32
    return %arg0, %arg1, %c0_i32 : i32, i32, i32
  }
  func.func @transform_1(%arg0: i32, %arg1: i32) -> (i32, i32, i32) {
    %c0_i32 = arith.constant 0 : i32
    %c0_i32_0 = arith.constant 0 : i32
    return %arg0, %arg1, %c0_i32 : i32, i32, i32
  }
  func.func @transform_2(%arg0: i32, %arg1: i32) -> (i32, i32, i32) {
    %c0_i32 = arith.constant 0 : i32
    %c0_i32_0 = arith.constant 0 : i32
    %c0_i32_1 = arith.constant 0 : i32
    return %arg0, %c0_i32, %c0_i32_0 : i32, i32, i32
  }
  func.func @transform_3(%arg0: i32, %arg1: i32) -> (i32, i32, i32) {
    %c0_i32 = arith.constant 0 : i32
    %c0_i32_0 = arith.constant 0 : i32
    %c0_i32_1 = arith.constant 0 : i32
    return %arg0, %c0_i32, %c0_i32_0 : i32, i32, i32
  }
  func.func @transform_4(%arg0: i32, %arg1: i32) -> (i32, i32, i32) {
    %c0_i32 = arith.constant 0 : i32
    %c0_i32_0 = arith.constant 0 : i32
    %c0_i32_1 = arith.constant 0 : i32
    return %arg0, %c0_i32, %c0_i32_0 : i32, i32, i32
  }
  func.func @transform_5(%arg0: i32, %arg1: i32) -> (i32, i32, i32) {
    %c0_i32 = arith.constant 0 : i32
    %c0_i32_0 = arith.constant 0 : i32
    %c0_i32_1 = arith.constant 0 : i32
    return %arg0, %c0_i32, %c0_i32_0 : i32, i32, i32
  }
  func.func @transform_6(%arg0: i32, %arg1: i32) -> (i32, i32, i32, i32) {
    %c0_i32 = arith.constant 0 : i32
    %c0_i32_0 = arith.constant 0 : i32
    %c0_i32_1 = arith.constant 0 : i32
    return %arg0, %arg1, %c0_i32, %c0_i32_0 : i32, i32, i32, i32
  }
}

</mosaic_0001>

<bundles_post_ra>
// kernel: tpu_custom_call.1
= control target key start
LH: loop header
LB: loop body
LE: loop exit
PB: predicated region body
PF: predicated region fallthrough
CT: control target
= control target key end

     0   :  { %s1858_s0 = inlined_call_operand.hbm [shape: f32[2,18,32], index: 0, kind: input, shape index: {}]   ;;  %s1859_s1 = inlined_call_operand.hbm [shape: f32[2,18,64], index: 1, kind: input, shape index: {}]   ;;  %s1860_s2 = inlined_call_operand.hbm [shape: bf16[2,32,32], index: 2, kind: input, shape index: {}]   ;;  %s1861_s3 = inlined_call_operand.hbm [shape: f32[2,1,32], index: 3, kind: input, shape index: {}]   ;;  %s1862_s4 = inlined_call_operand.hbm [shape: bf16[2,32,64], index: 4, kind: input, shape index: {}]   ;;  %s1863_s5 = inlined_call_operand.hbm [shape: f32[2,1,64], index: 5, kind: input, shape index: {}]   ;;  %s1864_s6 = inlined_call_operand.hbm [shape: f32[2,2,8,128], index: 6, kind: output, shape index: {}]  }
   0x1   :  { %1887 = sst [smem:[#allocation32_spill]] %s1860_s2 }
   0x2   :  { %1888 = sst [smem:[#allocation33_spill]] %s1861_s3 }
   0x3   :  { %1889 = sst [smem:[#allocation34_spill]] %s1864_s6 }
   0x4   :  { %11 = vsyncpa [#allocation3], 0 }
   0x5   :  { %13 = vsyncpa [#allocation3 + $0x1], 0 }
   0x6   :  { %14 = vsyncpa [#allocation6], 0 }
   0x7   :  { %16 = vsyncpa [#allocation6 + $0x1], 0 }
   0x8   :  { %17 = vsyncpa [#allocation9], 0 }
   0x9   :  { %18 = vsyncpa [#allocation12], 0 }
   0xa   :  { %19 = vsyncpa [#allocation4], 0 }
   0xb   :  { %21 = vsyncpa [#allocation4 + $0x1], 0  ;;  %s1419_s21 = smov 0   ;;  %s1421_s22 = smov 0  }
   0xc   :  { %s1423_s23 = smov 0   ;;  %s1425_s24 = smov 0  }
   0xd   :  { %s1427_s25 = smov 0   ;;  %s1429_s26 = smov 0  }
   0xe   :  { %s1431_s27 = smov 0   ;;  %s1433_s28 = smov 0  }
   0xf   :  { %s1435_s29 = smov 0   ;;  %s1437_s30 = smov 0  }
  0x10   :  { %s1439_s7 = smov 0  }
  0x11 LB: > { %1890 = sst [smem:[#allocation20_spill]] %s1331_s22  ;;  %s1475_s8 = sadd.s32 4294967295, %s1367_s7   ;;  %s1367_s7 = sphi %s1439_s7, %s27_s7   ;;  %s1363_s30 = sphi %s1437_s30, %s1944_s30   ;;  %s1359_s29 = sphi %s1435_s29, %s1943_s29   ;;  %s1355_s28 = sphi %s1433_s28, %s1942_s28   ;;  %s1351_s27 = sphi %s1431_s27, %s1941_s27   ;;  %s1347_s26 = sphi %s1429_s26, %s1940_s26   ;;  %s1343_s25 = sphi %s1427_s25, %s1939_s25   ;;  %s1339_s24 = sphi %s1425_s24, %s1938_s24   ;;  %s1335_s23 = sphi %s1423_s23, %s1934_s23   ;;  %s1331_s22 = sphi %s1421_s22, %s1933_s22   ;;  %s1327_s21 = sphi %s1419_s21, %s1932_s21  }
  0x12   : > { %1891 = sst [smem:[#allocation21_spill]] %s1335_s23  ;;  %s838_s9 = sadd.s32 4294967294, %s1367_s7  }
  0x13   : > { %1892 = sst [smem:[#allocation22_spill]] %s1339_s24  ;;  %s36_s10 = sadd.s32 1, %s1359_s29 }
  0x14   : > { %1893 = sst [smem:[#allocation23_spill]] %s1351_s27  ;;  %s39_s11 = sadd.s32 1, %s1363_s30 }
  0x15   : > { %1894 = sst [smem:[#allocation24_spill]] %s1475_s8  ;;  %p37_p0 = scmp.ge.s32.totalorder %s36_s10, 2 }
  0x16   : > { %s48_s12 = sadd.s32 1, %s1347_s26  ;;  %p55_p1 = scmp.ne.s32.totalorder %s1347_s26, %s1343_s25 }
  0x17   : > { %p56_p2 = scmp.eq.s32.totalorder %s1367_s7, 0  ;;  %s1946_s10 = smov (%p37_p0, %s36_s10), 0 }
  0x18   : > { %1895 = sst [smem:[#allocation25_spill]] %s1946_s10  ;;  %s1948_s11 = smov (!%p37_p0, %s39_s11), %s1363_s30 }
  0x19   : > { %s44_s13 = ssub.s32 %s1359_s29, %s1946_s10  ;;  %p1492_p3 = por %p56_p2, %p55_p1 }
  0x1a   : > { %p41_p4 = scmp.ge.s32.totalorder %s1948_s11, 2  ;;  %p61_p5 = scmp.ne.s32.totalorder %s1343_s25, %s1339_s24 }
  0x1b   : > { %s1896_s14 = scalar_select %p1492_p3, 1, 0 }
  0x1c   : > { %p62_p6 = scmp.eq.s32.totalorder %s1475_s8, 0  ;;  %s102_s15 = sadd.s32 1, %s1335_s23 }
  0x1d   : > { %s1950_s11 = smov (%p41_p4, %s1948_s11), 0  ;;  %p115_p8 = scmp.ne.s32.totalorder %s1331_s22, %s1327_s21 }
  0x1e   : > { %1897 = sst [smem:[#allocation26_spill]] %s1950_s11  ;;  %p1505_p7 = por %p62_p6, %p61_p5 }
  0x1f   : > { %s43_s17 = ssub.s32 %s1363_s30, %s1950_s11  ;;  %p219_p9 = scmp.eq.s32.totalorder %s1475_s8, 3 }
  0x20   : > { %s1898_s16 = scalar_select %p1505_p7, 1, 0 }
  0x21   : > { %s45_s18 = sor.u32 %s44_s13, %s43_s17  ;;  %p100_p10 = scmp.eq.s32.totalorder %s43_s17, 0 }
  0x22   : > { %p46_p11 = scmp.eq.s32.totalorder %s45_s18, 0  ;;  %p1514_p12 = por %p115_p8, %p62_p6 }
  0x23   : > { %s1519_s20 = scalar_select %p100_p10, %s1335_s23, %s102_s15  }
  0x24   : > { %s1899_s19 = scalar_select %p1514_p12, 1, 0 }
  0x25   : > { %1901 = sst [smem:[#allocation28_spill]] %s1519_s20  ;;  %p1527_p13 = por %p219_p9, %p55_p1 }
  0x26   : > { %1900 = sst [smem:[#allocation27_spill]] %s1899_s19  ;;  %p225_p0 = scmp.eq.s32.totalorder %s838_s9, 3 }
  0x27   : > { %s1522_s10 = scalar_select %p46_p11, %s1347_s26, %s48_s12  }
  0x28   : > { %s1903_s6 = scalar_select %p1527_p13, 1, 0 }
  0x29   : > { %1902 = sst [smem:[#allocation29_spill]] %s1522_s10  ;;  %p839_p2 = scmp.ge.s32.totalorder %s1367_s7, 1 }
  0x2a   : > { %1904 = sst [smem:[#allocation30_spill]] %s1903_s6  ;;  %p232_p4 = scmp.lt.s32.totalorder %s1367_s7, 5 }
  0x2b   : > { %p1536_p7 = por %p225_p0, %p61_p5  ;;  %s879_s13 = sshll.u32 %s1355_s28, 8 }
  0x2c   : > { %p1541_p6 = pnand %p839_p2, %p232_p4  ;;  %s1872_s12 = sshll.u32 %s1355_s28, 4 }
  0x2d   : > { %s1905_s21 = scalar_select %p1536_p7, 1, 0 }
  0x2e   : > { %s1907_s15 = scalar_select %p1541_p6, 1, 0 }
  0x2f   : > { %1906 = sst [smem:[#allocation31_spill]] %s1905_s21  ;;  %s1908_s3 = sld [smem:[#allocation33_spill]] }
  0x30   : > { %p919_p1 = pneg %p1541_p6  ;;  %s1369_s9 = smov [#allocation8]  }
  0x31   : > { %s263_s10 = sshll.u32 %s1369_s9, 4  ;;  %s1558_s22 = scalar_lea.hbm %s1862_s4, %s879_s13  ;;  %s264_s10 = int_to_ptr.vmem [resolvable:$true] %s263_s10 }
  0x32   : > { %p1562_p5 = pnand %p919_p1, %p1514_p12  ;;  %s1910_s2 = sld [smem:[#allocation32_spill]] }
  0x34   : > { %s1909_s21 = scalar_select %p1562_p5, 1, 0 }
  0x35   : > { %s1551_s11 = scalar_lea.hbm %s1908_s3, %s1872_s12  ;;  %p1575_p9 = pneg %p1562_p5 }
  0x36   : > { %s1053_s24 = scalar_lea.hbm %s1551_s11, 16  ;;  %s1058_s6 = scalar_lea.hbm %s1908_s3, 32 }
  0x37   : > { %p1054_p8 = scmp.ne.s32.totalorder %s1551_s11, %s1053_s24  ;;  %p1059_p0 = scmp.lt.u32.totalorder %s1551_s11, %s1908_s3 }
  0x38   : > { %s1569_s12 = scalar_lea.hbm %s1910_s2, %s879_s13  ;;  %p1060_p2 = scmp.lt.u32.totalorder %s1058_s6, %s1053_s24 }
  0x39   : > { %p1056_p10 = pnand %p1575_p9, %p1054_p8  ;;  %p1062_p1 = scmp.lt.u32.totalorder %s1053_s24, %s1551_s11 }
  0x3a   : > { %p1061_p4 = por %p1060_p2, %p1059_p0 }
  0x3b   : > { %p1057_p11 = pneg %p1056_p10 }
  0x3c   : > { %p1063_p7 = por %p1062_p1, %p1061_p4 }
  0x3e   : > { %p1064_p13 = pnand %p1063_p7, %p1057_p11 }
  0x40   : > { %1067 = shalt.err (!%p1064_p13)
}
  0x41   : > { %s1068_s13 = scalar_lea.vmem %s264_s10, 16  ;;  %s1075_s18 = scalar_lea.vmem %s264_s10, 32 }
  0x42   : > { %p1069_p12 = scmp.ne.s32.totalorder %s264_s10, %s1068_s13  ;;  %p1076_p6 = scmp.lt.s32.totalorder %s264_s10, %s264_s10 }
  0x43   : > { %p1077_p3 = scmp.lt.s32.totalorder %s1075_s18, %s1068_s13 }
  0x44   : > { %p1071_p8 = pnand %p1069_p12, %p1575_p9 }
  0x45   : > { %p1078_p5 = por %p1077_p3, %p1076_p6 }
  0x46   : > { %p1072_p10 = pneg %p1071_p8 }
  0x48   : > { %p1079_p0 = pnand %p1078_p5, %p1072_p10 }
  0x4a   : > { %1082 = shalt.err (!%p1079_p0)
}
  0x4b   : > { %p1912_p2 = scmp.ne.s32.totalorder %s1909_s21, 0  ;;  %s1370_s6 = smov [#allocation7]  }
  0x4c   : > { %s247_s24 = sshll.u32 %s1370_s6, 4  ;;  %s1083_s27 = scalar_lea.hbm %s1569_s12, 256  ;;  %s248_s24 = int_to_ptr.vmem [resolvable:$true] %s247_s24 }
  0x4d   : > { %925 = dma.hbm_to_vmem [thread:$0]  (!%p1912_p2), %s1551_s11, 16, %s264_s10, [#allocation9]  }
  0x4e   : > { %p1084_p7 = scmp.ne.s32.totalorder %s1569_s12, %s1083_s27  ;;  %s1088_s17 = scalar_lea.hbm %s1910_s2, 512 }
  0x4f   : > { %p1089_p3 = scmp.lt.u32.totalorder %s1569_s12, %s1910_s2  ;;  %p1090_p6 = scmp.lt.u32.totalorder %s1088_s17, %s1083_s27 }
  0x50   : > { %p1086_p12 = pnand %p1084_p7, %p1575_p9  ;;  %p1092_p11 = scmp.lt.u32.totalorder %s1083_s27, %s1569_s12 }
  0x51   : > { %p1091_p5 = por %p1090_p6, %p1089_p3 }
  0x52   : > { %p1087_p13 = pneg %p1086_p12 }
  0x53   : > { %p1093_p4 = por %p1092_p11, %p1091_p5 }
  0x55   : > { %p1094_p1 = pnand %p1093_p4, %p1087_p13 }
  0x57   : > { %1097 = shalt.err (!%p1094_p1)
}
  0x58   : > { %s1098_s10 = scalar_lea.vmem %s248_s24, 256  ;;  %p1106_p7 = scmp.lt.s32.totalorder %s248_s24, %s248_s24 }
  0x59   : > { %p1099_p8 = scmp.ne.s32.totalorder %s248_s24, %s1098_s10  ;;  %p1107_p12 = scmp.lt.s32.totalorder %s1098_s10, %s1098_s10 }
  0x5b   : > { %p1101_p10 = pnand %p1099_p8, %p1575_p9  ;;  %p1108_p2 = por %p1107_p12, %p1106_p7 }
  0x5d   : > { %p1102_p0 = pneg %p1101_p10 }
  0x5f   : > { %p1109_p3 = pnand %p1108_p2, %p1102_p0 }
  0x61   : > { %1112 = shalt.err (!%p1109_p3)
}
  0x62   : > { %s1886_s11 = smov 64   ;;  %s1372_s6 = smov 4  }
  0x63   : > { %p1913_p13 = scmp.ne.s32.totalorder %s1909_s21, 0  ;;  %s1914_s27 = sshll.u32 %s1355_s28, 4 }
  0x64   : > { %s1619_s17 = scalar_lea.hbm %s1863_s5, %s1914_s27  ;;  %s1373_s13 = smov [#allocation10]  }
  0x65   : > { %922 = dma.hbm_to_vmem [thread:$0]  (!%p1913_p13), %s1569_s12, 256, %s248_s24, [#allocation6], %s1886_s11, %s1886_s11, %s1372_s6  }
  0x66   : > { %s276_s18 = sshll.u32 %s1373_s13, 4  ;;  %s1374_s10 = smov [#allocation11]   ;;  %s277_s18 = int_to_ptr.vmem [resolvable:$true] %s276_s18 }
  0x67   : > { %s292_s2 = sshll.u32 %s1374_s10, 4  ;;  %s1113_s3 = scalar_lea.hbm %s1558_s22, 256  ;;  %s293_s2 = int_to_ptr.vmem [resolvable:$true] %s292_s2 }
  0x68   : > { %p1114_p2 = scmp.ne.s32.totalorder %s1558_s22, %s1113_s3  ;;  %s1118_s12 = scalar_lea.hbm %s1862_s4, 512 }
  0x69   : > { %p1119_p11 = scmp.lt.u32.totalorder %s1558_s22, %s1862_s4  ;;  %p1120_p4 = scmp.lt.u32.totalorder %s1118_s12, %s1113_s3 }
  0x6a   : > { %p1116_p6 = pnand %p1114_p2, %p1575_p9  ;;  %p1122_p8 = scmp.lt.u32.totalorder %s1113_s3, %s1558_s22 }
  0x6b   : > { %p1121_p1 = por %p1120_p4, %p1119_p11 }
  0x6c   : > { %p1117_p5 = pneg %p1116_p6 }
  0x6d   : > { %p1123_p10 = por %p1122_p8, %p1121_p1 }
  0x6f   : > { %p1124_p0 = pnand %p1123_p10, %p1117_p5 }
  0x71   : > { %1127 = shalt.err (!%p1124_p0)
}
  0x72   : > { %s1128_s27 = scalar_lea.vmem %s277_s18, 256  ;;  %p1136_p2 = scmp.lt.s32.totalorder %s277_s18, %s277_s18 }
  0x73   : > { %p1129_p7 = scmp.ne.s32.totalorder %s277_s18, %s1128_s27  ;;  %p1137_p6 = scmp.lt.s32.totalorder %s1128_s27, %s1128_s27 }
  0x75   : > { %p1131_p12 = pnand %p1129_p7, %p1575_p9  ;;  %p1138_p13 = por %p1137_p6, %p1136_p2 }
  0x77   : > { %p1132_p3 = pneg %p1131_p12 }
  0x79   : > { %p1139_p4 = pnand %p1138_p13, %p1132_p3 }
  0x7b   : > { %1142 = shalt.err (!%p1139_p4)
}
  0x7c   : > { %p1915_p11 = scmp.ne.s32.totalorder %s1909_s21, 0  ;;  %s1916_s8 = smov 64  }
  0x7d   : > { %s1143_s3 = scalar_lea.hbm %s1619_s17, 16  ;;  %s1148_s23 = scalar_lea.hbm %s1863_s5, 32 }
  0x7e   : > { %928 = dma.hbm_to_vmem [thread:$0]  (!%p1915_p11), %s1558_s22, 256, %s277_s18, [#allocation9], %s1916_s8, %s1916_s8, %s1372_s6  }
  0x7f   : > { %p1144_p5 = scmp.ne.s32.totalorder %s1619_s17, %s1143_s3  ;;  %p1149_p13 = scmp.lt.u32.totalorder %s1619_s17, %s1863_s5 }
  0x80   : > { %p1150_p10 = scmp.lt.u32.totalorder %s1148_s23, %s1143_s3  ;;  %p1152_p7 = scmp.lt.u32.totalorder %s1143_s3, %s1619_s17 }
  0x81   : > { %p1146_p1 = pnand %p1144_p5, %p1575_p9 }
  0x82   : > { %p1151_p0 = por %p1150_p10, %p1149_p13 }
  0x83   : > { %p1147_p8 = pneg %p1146_p1 }
  0x84   : > { %p1153_p12 = por %p1152_p7, %p1151_p0 }
  0x86   : > { %p1154_p3 = pnand %p1153_p12, %p1147_p8 }
  0x88   : > { %1157 = shalt.err (!%p1154_p3)
}
  0x89   : > { %s1158_s22 = scalar_lea.vmem %s293_s2, 16  ;;  %s1165_s6 = scalar_lea.vmem %s293_s2, 32 }
  0x8a   : > { %p1159_p2 = scmp.ne.s32.totalorder %s293_s2, %s1158_s22  ;;  %p1166_p5 = scmp.lt.s32.totalorder %s293_s2, %s293_s2 }
  0x8b   : > { %p1167_p1 = scmp.lt.s32.totalorder %s1165_s6, %s1158_s22 }
  0x8c   : > { %p1161_p6 = pnand %p1159_p2, %p1575_p9 }
  0x8d   : > { %p1168_p11 = por %p1167_p1, %p1166_p5 }
  0x8e   : > { %p1162_p4 = pneg %p1161_p6 }
  0x90   : > { %p1169_p10 = pnand %p1168_p11, %p1162_p4 }
  0x92   : > { %1172 = shalt.err (!%p1169_p10)
}
  0x93   : > { %p1917_p13 = scmp.ne.s32.totalorder %s1909_s21, 0  ;;  %p846_p0 = scmp.ge.s32.totalorder %s1367_s7, 4 }
  0x94   : > { %p1918_p8 = scmp.ne.s32.totalorder (!%p846_p0), %s1896_s14, 0 }
  0x95   : > { %931 = dma.hbm_to_vmem [thread:$0]  (!%p1917_p13), %s1619_s17, 16, %s293_s2, [#allocation12]  }
  0x96   : > { %299 = sbr.rel (%p846_p0) target bundleno = 233 (0xe9), region = 32 }
  0x9d   : > { %302 = sbr.rel (!%p1918_p8) target bundleno = 194 (0xc2), region = 36  ;;  %s303_s9 = sand.u32 (%p1918_p8), 1, %s1347_s26  }
  0x9e   : > { %s848_s18 = sshll.u32 (%p1918_p8), %s1359_s29, 1  ;;  %s847_s10 = sshll.u32 (%p1918_p8), %s303_s9, 4 }
  0x9f   : > { %s309_s12 = ssub.s32 (%p1918_p8), 3, %s848_s18  ;;  %s1666_s27 = scalar_lea.sflag (%p1918_p8), [#allocation3], %s303_s9 }
  0xa0   : > { %p310_p9 = scmp.lt.s32.totalorder (%p1918_p8), %s309_s12, 2  ;;  %s307_s2 = scalar_lea.vmem (%p1918_p8), [#allocation2], %s847_s10 }
  0xa4   : > { %s1952_s12 = smov (!%p310_p9, %s309_s12), 2 }
  0xa5   : > { %s1663_s24 = sshll.u32 %s1952_s12, 7 }
  0xa6   : > { %s314_s21 = ssub.s32 256, %s1663_s24 }
  0xa7   : > { %315 = vsyncadd %s1666_s27, %s314_s21  ;;  %p850_p11 = scmp.ne.s32.totalorder %s1663_s24, 0  ;;  %s903_s17 = smul.u32 3, %s1363_s30 }
  0xa8   : > { %s322_s8 = sshll.u32 %s307_s2, 4  ;;  %s1177_s9 = scalar_lea.hbm %s1858_s0, 768  ;;  %s1671_s8 = int_to_ptr.vmem [resolvable:$true] %s322_s8 }
  0xa9   : > { %s318_s3 = sadd.s32 %s903_s17, %s848_s18 }
  0xaa   : > { %s851_s19 = sshll.u32 %s318_s3, 7 }
  0xab   : > { %s1676_s20 = scalar_lea.hbm %s1858_s0, %s851_s19 }
  0xac   : > { %s1173_s13 = scalar_lea.hbm %s1676_s20, %s1663_s24  ;;  %p1178_p2 = scmp.lt.u32.totalorder %s1676_s20, %s1858_s0 }
  0xad   : > { %p1174_p7 = scmp.ne.s32.totalorder %s1676_s20, %s1173_s13  ;;  %p1179_p6 = scmp.lt.u32.totalorder %s1177_s9, %s1173_s13 }
  0xae   : > { %p1181_p5 = scmp.lt.u32.totalorder %s1173_s13, %s1676_s20 }
  0xaf   : > { %p1175_p12 = pnand %p1174_p7, %p850_p11  ;;  %p1180_p4 = por %p1179_p6, %p1178_p2 }
  0xb1   : > { %p1176_p3 = pneg %p1175_p12  ;;  %p1182_p1 = por %p1181_p5, %p1180_p4 }
  0xb3   : > { %p1183_p10 = pnand %p1182_p1, %p1176_p3 }
  0xb5   : > { %1186 = shalt.err (!%p1183_p10)
}
  0xb6   : > { %s1187_s12 = scalar_lea.vmem %s1671_s8, %s1663_s24  ;;  %s1375_s21 = smov [#allocation2]  }
  0xb7   : > { %p1188_p13 = scmp.ne.s32.totalorder %s1671_s8, %s1187_s12  ;;  %s1191_s2 = sshll.u32 %s1375_s21, 4  ;;  %s1192_s2 = int_to_ptr.vmem [resolvable:$false] %s1191_s2 }
  0xb8   : > { %s1193_s17 = scalar_lea.vmem %s1192_s2, 512  ;;  %p1194_p9 = scmp.lt.s32.totalorder %s1671_s8, %s1192_s2 }
  0xb9   : > { %p1189_p0 = pnand %p1188_p13, %p850_p11  ;;  %p1195_p7 = scmp.lt.s32.totalorder %s1193_s17, %s1187_s12 }
  0xbb   : > { %p1190_p8 = pneg %p1189_p0  ;;  %p1196_p12 = por %p1195_p7, %p1194_p9 }
  0xbd   : > { %p1197_p2 = pnand %p1196_p12, %p1190_p8 }
  0xbf   : > { %1200 = shalt.err (!%p1197_p2)
}
  0xc0   : > { %s1376_s3 = smov 128   ;;  %s1377_s19 = smov 8  }
  0xc1   : > { %328 = dma.hbm_to_vmem [thread:$0]  (%p850_p11), %s1676_s20, %s1663_s24, %s1671_s8, %s1666_s27, %s1376_s3, %s1376_s3, %s1377_s19  }
  0xc2 PF: > { %p1919_p3 = scmp.ne.s32.totalorder %s1896_s14, 0 }
  0xc3   : > { %s332_s11 = sand.u32 (%p1919_p3), 1, %s1367_s7   ;;  %s334_s23 = sand.u32 (%p1919_p3), 1, %s1347_s26  }
  0xc4   : > { %331 = sbr.rel (!%p1919_p3) target bundleno = 233 (0xe9), region = 40  ;;  %s854_s13 = sshll.u32 (%p1919_p3), %s334_s23, 4 }
  0xc5   : > { %s855_s22 = sshll.u32 (%p1919_p3), %s1359_s29, 1  ;;  %s1711_s10 = scalar_lea.sflag (%p1919_p3), [#allocation6], %s332_s11 }
  0xc6   : > { %s338_s6 = ssub.s32 (%p1919_p3), 3, %s855_s22  ;;  %s336_s24 = scalar_lea.vmem (%p1919_p3), [#allocation5], %s854_s13 }
  0xc7   : > { %p339_p6 = scmp.lt.s32.totalorder (%p1919_p3), %s338_s6, 2 }
  0xcb   : > { %s1954_s6 = smov (!%p339_p6, %s338_s6), 2 }
  0xcc   : > { %s1708_s9 = sshll.u32 %s1954_s6, 7 }
  0xcd   : > { %s343_s18 = ssub.s32 256, %s1708_s9 }
  0xce   : > { %344 = vsyncadd %s1711_s10, %s343_s18  ;;  %p857_p11 = scmp.ne.s32.totalorder %s1708_s9, 0  ;;  %s904_s14 = smul.u32 3, %s1363_s30 }
  0xcf   : > { %s351_s27 = sshll.u32 %s336_s24, 4  ;;  %s1205_s11 = scalar_lea.hbm %s1859_s1, 768  ;;  %s1716_s27 = int_to_ptr.vmem [resolvable:$true] %s351_s27 }
  0xd0   : > { %s347_s8 = sadd.s32 %s904_s14, %s855_s22 }
  0xd1   : > { %s858_s20 = sshll.u32 %s347_s8, 7 }
  0xd2   : > { %s1721_s2 = scalar_lea.hbm %s1859_s1, %s858_s20 }
  0xd3   : > { %s1201_s17 = scalar_lea.hbm %s1721_s2, %s1708_s9  ;;  %p1206_p10 = scmp.lt.u32.totalorder %s1721_s2, %s1859_s1 }
  0xd4   : > { %p1202_p4 = scmp.ne.s32.totalorder %s1721_s2, %s1201_s17  ;;  %p1207_p13 = scmp.lt.u32.totalorder %s1205_s11, %s1201_s17 }
  0xd5   : > { %p1209_p8 = scmp.lt.u32.totalorder %s1201_s17, %s1721_s2 }
  0xd6   : > { %p1203_p5 = pnand %p1202_p4, %p857_p11  ;;  %p1208_p0 = por %p1207_p13, %p1206_p10 }
  0xd8   : > { %p1204_p1 = pneg %p1203_p5  ;;  %p1210_p9 = por %p1209_p8, %p1208_p0 }
  0xda   : > { %p1211_p7 = pnand %p1210_p9, %p1204_p1 }
  0xdc   : > { %1214 = shalt.err (!%p1211_p7)
}
  0xdd   : > { %s1215_s22 = scalar_lea.vmem %s1716_s27, %s1708_s9  ;;  %s1378_s6 = smov [#allocation5]  }
  0xde   : > { %p1216_p12 = scmp.ne.s32.totalorder %s1716_s27, %s1215_s22  ;;  %s1219_s18 = sshll.u32 %s1378_s6, 4  ;;  %s1220_s18 = int_to_ptr.vmem [resolvable:$false] %s1219_s18 }
  0xdf   : > { %s1221_s24 = scalar_lea.vmem %s1220_s18, 512  ;;  %p1222_p6 = scmp.lt.s32.totalorder %s1716_s27, %s1220_s18 }
  0xe0   : > { %p1217_p2 = pnand %p1216_p12, %p857_p11  ;;  %p1223_p4 = scmp.lt.s32.totalorder %s1221_s24, %s1215_s22 }
  0xe2   : > { %p1218_p3 = pneg %p1217_p2  ;;  %p1224_p5 = por %p1223_p4, %p1222_p6 }
  0xe4   : > { %p1225_p10 = pnand %p1224_p5, %p1218_p3 }
  0xe6   : > { %1228 = shalt.err (!%p1225_p10)
}
  0xe7   : > { %s1379_s14 = smov 128   ;;  %s1380_s8 = smov 8  }
  0xe8   : > { %357 = dma.hbm_to_vmem [thread:$0]  (%p857_p11), %s1721_s2, %s1708_s9, %s1716_s27, %s1711_s10, %s1379_s14, %s1379_s14, %s1380_s8  }
  0xe9 PF: > { %p1920_p1 = scmp.ne.s32.totalorder %s1907_s15, 0 }
  0xea   : > { %s1751_s20 = sand.u32 (!%p1920_p1), 1, %s1343_s25   ;;  %p1921_p13 = scmp.ne.s32.totalorder (!%p1920_p1), %s1898_s16, 0 }
  0xeb   : > { %363 = sbr.rel (%p1920_p1) target bundleno = 1125 (0x465), region = 44  ;;  %s862_s12 = sshll.u32 (!%p1920_p1), %s1751_s20, 4 }
  0xec   : > { %s366_s21 = scalar_lea.sflag (!%p1920_p1), [#allocation3], %s1751_s20  ;;  %s369_s17 = scalar_lea.vmem (!%p1920_p1), [#allocation2], %s862_s12 }
  0xf2   : > { %1302 = dma.done.wait (%p1921_p13), %s366_s21, 256  }
  0xf3   : > { %1304 = vsyncadd (%p1921_p13), %s366_s21, 4294967040  ;;  %s1922_s9 = sld [smem:[#allocation24_spill]]  ;;  %s1760_s15 = scalar_lea.vmem [#allocation5], %s862_s12 }
  0xf9   : > { %s374_s10 = sand.u32 1, %s1922_s9  }
  0xfa   : > { %s375_s27 = scalar_lea.sflag [#allocation6], %s374_s10 }
  0xfb   : > { %1306 = dma.done.wait (%p1921_p13), %s375_s27, 256  }
  0xfc   : > { %1308 = vsyncadd (%p1921_p13), %s375_s27, 4294967040  ;;  %s1923_s2 = sld [smem:[#allocation27_spill]] }
 0x102   : > { %p1924_p11 = scmp.ne.s32.totalorder %s1923_s2, 0 }
 0x104   : > { %1310 = dma.done.wait (%p1924_p11), [#allocation6], 256  }
 0x105   : > { %1312 = vsyncadd (%p1924_p11), [#allocation6], 4294967040 }
 0x106   : > { %1314 = dma.done.wait (%p1924_p11), [#allocation9], 272  }
 0x107   : > { %1316 = vsyncadd (%p1924_p11), [#allocation9], 4294967024 }
 0x108   : > { %1318 = dma.done.wait (%p1924_p11), [#allocation12], 16  }
 0x109   : > { %1320 = vsyncadd (%p1924_p11), [#allocation12], 4294967280  ;;  %v1381_v0 = vmov 0.0   ;;  %vm1382_vm0 = vmmov 0   ;;  %v1037_v1 = vld [vmem:[#allocation7] sm:$0xff]   ;;  %v1038_v2 = vld [vmem:[#allocation7 + $0x8] sm:$0xff]   ;;  %v636_v63 = vlaneseq }
 0x10a   : > { %887 = vmatprep.subr.bf16.mxu0 %v1381_v0  ;;  %891 = vmatprep.mubr.msk.bf16.mxu0 %vm1382_vm0, %v1381_v0  ;;  %v439_v3 = vld [vmem:[%s369_s17] sm:$0xff]  ;;  %v440_v4 = vld [vmem:[%s369_s17 + $0x8] sm:$0xff]  ;;  %vm470_vm1 = vcmask 261120   ;;  %vm601_vm2 = vcmask 523264   ;;  %s1925_s16 = sld [smem:[#allocation23_spill]]  ;;  %vm648_vm5 = vcmask 7168  }
 0x10b   : > { %895 = vmatprep.subr.bf16.mxu1 %v1381_v0  ;;  %899 = vmatprep.mubr.msk.bf16.mxu1 %vm1382_vm0, %v1381_v0  ;;  %v451_v5 = vpack.c.bf16 %v440_v4, %v439_v3  ;;  %v1039_v6 = vld [vmem:[#allocation10] sm:$0xff]   ;;  %v1040_v7 = vld [vmem:[#allocation10 + $0x8] sm:$0xff]   ;;  %v865_v11 = vld [vmem:[#allocation8] ss:$0 sm:$0xff]  ;;  %s1926_s19 = sld [smem:[#allocation30_spill]]  ;;  %s864_s11 = sshll.u32 %s1751_s20, 3 }
 0x10c   : > { %888 = vmatpush3.bf16.msra.mxu0 %v1037_v1  ;;  %896 = vmatpush3.bf16.msra.mxu1 %v1039_v6  ;;  %v596_v8 = vld [vmem:[%s1760_s15] sm:$0xff]  ;;  %v597_v37 = vld [vmem:[%s1760_s15 + $0x8] sm:$0xff]  ;;  %s875_s23 = sshll.u32 %s1355_s28, 1  ;;  %s427_s22 = scalar_lea.vmem [#allocation13], %s864_s11 }
 0x10d   : > { %889 = vmatprep.subr.bf16.mxu0 %v1381_v0  ;;  %897 = vmatprep.subr.bf16.mxu1 %v1381_v0  ;;  %v616_v9 = vmul.f32 %v596_v8, %v596_v8  ;;  %v617_v38 = vmul.f32 %v597_v37, %v597_v37  ;;  %v869_v40 = vld [vmem:[#allocation11] ss:$0 sm:$0xff]  ;;  %v637_v0 = vshrl.u32 %v636_v63, 7  ;;  %s679_s6 = sshll.u32 %s427_s22, 4  ;;  %s1927_s12 = sld [smem:[#allocation34_spill]]  ;;  %s1792_s6 = int_to_ptr.vmem [resolvable:$true] %s679_s6 }
 0x10e   : > { %s664_s17 = scalar_lea.sflag [#allocation4], %s1751_s20  ;;  %s1229_s9 = scalar_lea.vmem %s1792_s6, 128 }
 0x10f   : > { %v618_v10 = vsel %vm601_vm2, %v616_v9, 0.0  ;;  %v621_v39 = vsel %vm601_vm2, %v617_v38, 0.0  ;;  %p1230_p0 = scmp.ne.s32.totalorder %s1792_s6, %s1229_s9  ;;  %s1383_s28 = smov [#allocation13]  }
 0x110   : > { %890 = vmatpush3.bf16.msra.mxu0 %v1038_v2  ;;  %898 = vmatpush3.bf16.msra.mxu1 %v1040_v7  ;;  %s873_s3 = sshll.u32 %s1925_s16, 4  ;;  %s675_s13 = sadd.s32 %s1925_s16, %s875_s23 }
 0x111   : > { %619 = vadd.xlane.f32.xlu1 %v618_v10  ;;  %v639_v2 = vstv %s873_s3  ;;  %s876_s18 = sshll.u32 %s675_s13, 7  ;;  %p1928_p8 = scmp.ne.s32.totalorder %s1926_s19, 0 }
 0x112   : > { %v640_v7 = vadd.s32 %v639_v2, %v637_v0  ;;  %s1233_s10 = sshll.u32 %s1383_s28, 4  ;;  %s1234_s10 = int_to_ptr.vmem [resolvable:$false] %s1233_s10 }
 0x113   : > { %892 = vmatmul.mubr.msk.bf16.vlgmr.msra.gmra.mrb[0].mxu0 %vm470_vm1, %v451_v5  ;;  %v638_v5 = vadd.s32 8, %v637_v0  ;;  %s1797_s21 = scalar_lea.hbm %s1927_s12, %s876_s18  ;;  %p1231_p9 = pnand %p1230_p0, %p1928_p8 }
 0x114   : > { %vm642_vm3 = vcmp.lt.s32.totalorder %v640_v7, 18  ;;  %s1235_s27 = scalar_lea.vmem %s1234_s10, 256  ;;  %p1236_p12 = scmp.lt.s32.totalorder %s1792_s6, %s1234_s10 }
 0x115   : > { %622 = vadd.xlane.f32.xlu1 %v621_v39  ;;  %p1232_p7 = pneg %p1231_p9  ;;  %p1237_p2 = scmp.lt.s32.totalorder %s1235_s27, %s1229_s9 }
 0x117   : > { %p1238_p3 = por %p1237_p2, %p1236_p12 }
 0x119   : > { %p1239_p6 = pnand %p1238_p3, %p1232_p7 }
 0x19e   : > { %v620_v55 = vpop.xlane.xlu1 %619 }
 0x19f   : > { %v630_v56 = vmax.f32 %v620_v55, 1e-24 }
 0x1a2   : > { %v623_v58 = vpop.xlane.xlu1 %622 }
 0x1a3   : > { %v631_v60 = vmax.f32 %v623_v58, 1e-24 }
 0x1e6   : > { %v508_v12 = vpop.f32.mrb[0].mxu0 }
 0x1e7   : > { %v509_v13 = vadd.f32 %v865_v11, %v508_v12  ;;  %v893_v14 = vpop.f32.mrb[1].mxu0  ;;  %v641_v12 = vadd.s32 %v639_v2, %v638_v5 }
 0x1e8   : > { %v511_v15 = vpop.f32.mrb[2].mxu0 }
 0x1e9   : > { %v515_v16 = vmul.f32 %v509_v13, %v509_v13  ;;  %v512_v17 = vadd.f32 %v865_v11, %v511_v15  ;;  %v894_v18 = vpop.f32.mrb[3].mxu0  ;;  %vm643_vm4 = vcmp.lt.s32.totalorder %v641_v12, 18 }
 0x1eb   : > { %v517_v19 = vmul.f32 %v515_v16, %v509_v13  ;;  %v516_v20 = vmul.f32 %v512_v17, %v512_v17 }
 0x1ed   : > { %v519_v21 = vmul.f32 0.044715, %v517_v19  ;;  %v518_v22 = vmul.f32 %v516_v20, %v512_v17 }
 0x1ef   : > { %v521_v23 = vadd.f32 %v519_v21, %v509_v13  ;;  %v520_v24 = vmul.f32 0.044715, %v518_v22 }
 0x1f1   : > { %v523_v25 = vmul.f32 0.7978846, %v521_v23  ;;  %v522_v26 = vadd.f32 %v520_v24, %v512_v17 }
 0x1f3   : > { %1041 = vtanh.f32 %v523_v25  ;;  %v524_v27 = vmul.f32 0.7978846, %v522_v26 }
 0x1f5   : > { %1043 = vtanh.f32 %v524_v27 }
 0x1f6   : > { %1045 = vrsqrt.f32 %v630_v56 }
 0x1fd   : > { %v1042_v28 = vpop.eup %1041 }
 0x1fe   : > { %v527_v29 = vadd.f32 1.0, %v1042_v28 }
 0x1ff   : > { %v1044_v30 = vpop.eup %1043 }
 0x200   : > { %v529_v31 = vmul.f32 0.5, %v527_v29  ;;  %v528_v32 = vadd.f32 1.0, %v1044_v30  ;;  %v1046_v1 = vpop.eup %1045 }
 0x202   : > { %v530_v33 = vmul.f32 0.5, %v528_v32  ;;  %v531_v34 = vmul.f32 %v529_v31, %v509_v13 }
 0x204   : > { %v532_v35 = vmul.f32 %v530_v33, %v512_v17 }
 0x206   : > { %v533_v36 = vpack.c.bf16 %v532_v35, %v531_v34 }
 0x208   : > { %900 = vmatmul.mubr.msk.bf16.vlgmr.msra.gmra.mrb[0].mxu1 %vm470_vm1, %v533_v36 }
 0x2db   : > { %v589_v41 = vpop.f32.mrb[0].mxu1 }
 0x2dc   : > { %v590_v42 = vadd.f32 %v869_v40, %v589_v41  ;;  %v901_v43 = vpop.f32.mrb[1].mxu1 }
 0x2dd   : > { %v592_v44 = vpop.f32.mrb[2].mxu1 }
 0x2de   : > { %v593_v45 = vadd.f32 %v869_v40, %v592_v44  ;;  %v902_v46 = vpop.f32.mrb[3].mxu1  ;;  %v608_v47 = vmul.f32 %v590_v42, %v590_v42  ;;  %v599_v53 = vmul.f32 %v596_v8, %v590_v42 }
 0x2e0   : > { %v610_v48 = vsel %vm601_vm2, %v608_v47, 0.0  ;;  %v600_v49 = vmul.f32 %v597_v37, %v593_v45  ;;  %v609_v50 = vmul.f32 %v593_v45, %v593_v45  ;;  %v602_v54 = vsel %vm601_vm2, %v599_v53, 0.0 }
 0x2e1   : > { %611 = vadd.xlane.f32.xlu0 %v610_v48 }
 0x2e2   : > { %v605_v51 = vsel %vm601_vm2, %v600_v49, 0.0  ;;  %v613_v52 = vsel %vm601_vm2, %v609_v50, 0.0 }
 0x2e3   : > { %606 = vadd.xlane.f32.xlu1 %v605_v51 }
 0x2e5   : > { %614 = vadd.xlane.f32.xlu0 %v613_v52 }
 0x2e9   : > { %603 = vadd.xlane.f32.xlu0 %v602_v54 }
 0x36e   : > { %v612_v57 = vpop.xlane.xlu0 %611 }
 0x36f   : > { %v624_v59 = vmax.f32 %v612_v57, 1e-24 }
 0x370   : > { %v607_v11 = vpop.xlane.xlu1 %606 }
 0x371   : > { %1047 = vrsqrt.f32 %v624_v59 }
 0x372   : > { %v615_v61 = vpop.xlane.xlu0 %614  ;;  %1049 = vrsqrt.f32 %v631_v60 }
 0x373   : > { %v625_v62 = vmax.f32 %v615_v61, 1e-24 }
 0x375   : > { %1051 = vrsqrt.f32 %v625_v62 }
 0x376   : > { %v604_v4 = vpop.xlane.xlu0 %603 }
 0x37b   : > { %v1048_v3 = vpop.eup %1047 }
 0x37c   : > { %v628_v6 = vmul.f32 %v1048_v3, %v604_v4  ;;  %v1050_v8 = vpop.eup %1049 }
 0x37e   : > { %v634_v9 = vmul.f32 %v1046_v1, %v628_v6 }
 0x37f   : > { %v1052_v10 = vpop.eup %1051 }
 0x380   : > { %v644_v13 = vsub.f32 0.0, %v634_v9  ;;  %v629_v14 = vmul.f32 %v1052_v10, %v607_v11 }
 0x382   : > { %v635_v15 = vmul.f32 %v1050_v8, %v629_v14  ;;  %v646_v17 = vsel %vm642_vm3, %v644_v13, 0.0 }
 0x383   : > { %v649_v19 = vsel %vm648_vm5, %v646_v17, 0.0 }
 0x384   : > { %v645_v16 = vsub.f32 0.0, %v635_v15 }
 0x386   : > { %v647_v18 = vsel %vm643_vm4, %v645_v16, 0.0 }
 0x387   : > { %v650_v20 = vsel %vm648_vm5, %v647_v18, 0.0 }
 0x388   : > { %v651_v21 = vadd.f32 %v650_v20, %v649_v19 }
 0x38a   : > { %652 = vadd.xlane.f32.xlu0 %v651_v21 }
 0x417   : > { %v653_v22 = vpop.xlane.xlu0 %652 }
 0x418   : > { %v654_v23 = vrot.slane %v653_v22, 4 }
 0x41a   : > { %v655_v24 = vadd.f32 %v654_v23, %v653_v22 }
 0x41c   : > { %v656_v25 = vrot.slane %v655_v24, 2 }
 0x41e   : > { %v657_v26 = vadd.f32 %v656_v25, %v655_v24 }
 0x420   : > { %v658_v27 = vrot.slane %v657_v26, 1 }
 0x422   : > { %v659_v28 = vadd.f32 %v658_v27, %v657_v26 }
 0x424   : > { %905 = vpush %v659_v28 }
 0x455   : > { %s906_s24 = spop %905 }
 0x456   : > { %v661_v29 = vstv %s906_s24 }
 0x457   : > { %662 = vst [vmem:[%s427_s22] sm:$0xff] %v661_v29 }
 0x458   : > { %1242 = shalt.err (!%p1239_p6)
}
 0x459   : > { %s1243_s20 = scalar_lea.hbm %s1797_s21, 128  ;;  %s1247_s16 = scalar_lea.hbm %s1927_s12, 512 }
 0x45a   : > { %p1244_p4 = scmp.ne.s32.totalorder %s1797_s21, %s1243_s20  ;;  %p1248_p1 = scmp.lt.u32.totalorder %s1797_s21, %s1927_s12 }
 0x45b   : > { %p1249_p13 = scmp.lt.u32.totalorder %s1247_s16, %s1243_s20  ;;  %p1251_p0 = scmp.lt.u32.totalorder %s1243_s20, %s1797_s21 }
 0x45c   : > { %p1245_p5 = pnand %p1244_p4, %p1928_p8 }
 0x45d   : > { %p1250_p11 = por %p1249_p13, %p1248_p1 }
 0x45e   : > { %p1246_p10 = pneg %p1245_p5 }
 0x45f   : > { %p1252_p9 = por %p1251_p0, %p1250_p11 }
 0x461   : > { %p1253_p7 = pnand %p1252_p9, %p1246_p10 }
 0x463   : > { %1256 = shalt.err (!%p1253_p7)
}
 0x464   : > { %917 = dma.vmem_to_hbm [thread:$0]  (%p1928_p8), %s1792_s6, 128, %s1797_s21, %s664_s17  }
 0x465 PF: > { %s1929_s23 = sld [smem:[#allocation22_spill]]  ;;  %s1930_s13 = sld [smem:[#allocation31_spill]] }
 0x466   : > { %p936_p12 = scmp.ge.s32.totalorder %s1367_s7, 2 }
 0x46b   : > { %s691_s22 = sand.u32 1, %s1929_s23   ;;  %p1931_p2 = scmp.ne.s32.totalorder %s1930_s13, 0 }
 0x46c   : > { %s692_s18 = scalar_lea.sflag [#allocation4], %s691_s22 }
 0x46d   : > { %p933_p3 = pnand %p936_p12, %p1931_p2 }
 0x46f   : > { %1322 = dma.done.wait (!%p933_p3), %s692_s18, 128  }
 0x470   : > { %1324 = vsyncadd (!%p933_p3), %s692_s18, 4294967168  ;;  %s27_s7 = sadd.s32 1, %s1367_s7   ;;  %s1932_s21 = sld [smem:[#allocation20_spill]] }
 0x471   : > { %p24_p6 = scmp.ge.s32.totalorder %s27_s7, 6   ;;  %s1933_s22 = sld [smem:[#allocation21_spill]] }
 0x472   : > { %s1934_s23 = sld [smem:[#allocation28_spill]]  ;;  %s1935_s19 = sld [smem:[#allocation29_spill]] }
 0x473   : > { %s1936_s6 = sld [smem:[#allocation25_spill]]  ;;  %s1937_s14 = sld [smem:[#allocation26_spill]] }
 0x474   : > { %s1938_s24 = smov %s1343_s25  ;;  %s1939_s25 = smov %s1347_s26 }
 0x475   : > { %s1941_s27 = smov %s1359_s29  ;;  %s1942_s28 = smov %s1363_s30 }
 0x476   :  { %26 = sbr.rel (!%p24_p6) target bundleno = 17 (0x11), region = 122 }
 0x478   : > { %s1940_s26 = smov %s1935_s19 }
 0x479   : > { %s1943_s29 = smov %s1936_s6  ;;  %s1944_s30 = smov %s1937_s14 }
 0x47d   :  { %697 = vsyncpa [#allocation3], 1 }
 0x47e   :  { %699 = vsyncpa [#allocation3 + $0x1], 1 }
 0x47f   :  { %700 = vsyncpa [#allocation6], 1 }
 0x480   :  { %702 = vsyncpa [#allocation6 + $0x1], 1 }
 0x481   :  { %703 = vsyncpa [#allocation9], 1 }
 0x482   :  { %704 = vsyncpa [#allocation12], 1 }
 0x483   :  { %705 = vsyncpa [#allocation4], 1 }
 0x484   :  { %707 = vsyncpa [#allocation4 + $0x1], 1 }

</bundles_post_ra>
